<compile_context>
chip_gen: v5e
topology: v5e:2x2
jax: 0.10.0
libtpu: 0.0.40
codegen_flags: <defaults>
</compile_context>

<pallas_src>
import functools

import jax
import jax.numpy as jnp
from jax import lax
from jax.experimental import pallas as pl
from jax.experimental.pallas import tpu as pltpu


# ----------------------------- Pallas kernel ------------------------------- #

def _trad_rnn_kernel(*refs, n_layers, use_all_h):
    """Fused multi-layer Elman RNN + Linear head (wavefront over layers).

    Ref order:
      x_ref                        (T, bb, F)     time-major input block
      per layer l: wih_l (F_l,H), whh_l (H,H), b_l (1,H)   [b = b_ih + b_hh]
      fc_w_ref                     (T, H, O) if use_all_h else (H, O)
      fc_b_ref                     (1, O)
      out_ref                      (bb, O)
      xw0_ref    scratch           (T, bb, H)     hoisted layer-0 projection
      hlast_ref  scratch           (T, bb, H)     last-layer hiddens (use_all_h)
    """
    x_ref = refs[0]
    w_refs = refs[1:1 + 3 * n_layers]
    fc_w_ref = refs[1 + 3 * n_layers]
    fc_b_ref = refs[2 + 3 * n_layers]
    out_ref = refs[3 + 3 * n_layers]
    xw0_ref = refs[4 + 3 * n_layers]
    hlast_ref = refs[5 + 3 * n_layers] if use_all_h else None

    T, Bb, F0 = x_ref.shape
    H = w_refs[1].shape[1]

    # Hoisted: load weights / biases once (not per diagonal step).
    wih = [w_refs[3 * l][...] for l in range(n_layers)]
    whh = [w_refs[3 * l + 1][...] for l in range(n_layers)]
    bias = [w_refs[3 * l + 2][...] for l in range(n_layers)]

    # ---- Layer-0 input projection: one big (T*Bb, F0) @ (F0, H) MXU GEMM ----
    # Stored time-major so the recurrence reads xw0_ref[t] (free leading-dim
    # index) and live ranges are bounded by the VMEM scratch.
    x = x_ref[...].astype(jnp.float32)                       # (T, Bb, F0)
    xw0 = (jnp.dot(x.reshape(T * Bb, F0), wih[0],
                   preferred_element_type=jnp.float32)
           .reshape(T, Bb, H) + bias[0])                     # bias folded in
    xw0_ref[...] = xw0

    # ---- Wavefront over (layer, time) diagonals ----------------------------
    # At diagonal s, layer l executes time step t = s - l.  Layer l reads
    # layer l-1's h_t (produced at diagonal s-1) and its own h_{t-1}; the
    # dependent chains of different layers therefore overlap.
    h = [jnp.zeros((Bb, H), jnp.float32) for _ in range(n_layers)]
    last = n_layers - 1

    for s in range(T + n_layers - 1):
        prev = list(h)                       # snapshot of diagonal s-1 states
        for l in range(n_layers):
            t = s - l
            if not (0 <= t < T):
                continue
            if l == 0:
                pre = xw0_ref[t]                              # (Bb, H)
            else:
                # Per-step input projection for stacked layers: independent of
                # this layer's serial chain (depends on prev diagonal only).
                pre = (jnp.dot(prev[l - 1], wih[l],
                               preferred_element_type=jnp.float32) + bias[l])
            if t > 0:                                         # h_{-1} == 0
                pre = pre + jnp.dot(prev[l], whh[l],
                                    preferred_element_type=jnp.float32)
            h_new = jnp.tanh(pre)
            h[l] = h_new
            if l == last and use_all_h:
                # Leading-dim store into VMEM scratch (off the dep chain).
                hlast_ref[t] = h_new

    # ---- FC head epilogue (off the recurrence path) -------------------------
    fc_b = fc_b_ref[...]                                      # (1, O)
    if use_all_h:
        hs = hlast_ref[...]                                   # (T, Bb, H)
        fc_w = fc_w_ref[...]                                  # (T, H, O)
        # einsum('tbh,tho->bo'): batched matmul over t, then reduce over t.
        tbo = lax.dot_general(hs, fc_w,
                              dimension_numbers=(((2,), (1,)), ((0,), (0,))),
                              preferred_element_type=jnp.float32)  # (T, Bb, O)
        out = jnp.sum(tbo, axis=0) + fc_b
    else:
        out = (jnp.dot(h[last], fc_w_ref[...],
                       preferred_element_type=jnp.float32) + fc_b)
    out_ref[...] = out.astype(out_ref.dtype)


# --------------------------- Wrapper / pallas_call -------------------------- #

def _full_spec(shape):
    nd = len(shape)
    return pl.BlockSpec(shape, lambda i, _nd=nd: (0,) * _nd)


def _vmem_capacity_bytes():
    try:
        return int(pltpu.get_tpu_info().vmem_capacity_bytes)
    except Exception:
        return 64 * 1024 * 1024          # conservative: v7x per-TC VMEM


def _batch_block(B, per_sample_bytes, budget_bytes):
    """Largest 8-aligned divisor of B that fits the VMEM budget and leaves at
    least 2 grid steps when B >= 16 (so v7x's two TensorCores both get work)."""
    if B <= 8:
        return B
    cands = sorted((bb for bb in range(8, B + 1, 8) if B % bb == 0),
                   reverse=True)
    for bb in cands:
        if bb * per_sample_bytes > budget_bytes:
            continue
        if B >= 16 and B // bb < 2:
            continue
        return bb
    return 8 if B % 8 == 0 else B


@functools.partial(jax.jit, static_argnames=("use_all_h",))
def trad_rnn_forward(params, x, use_all_h=True):
    """x: (B, T, input_size) batch_first, like the PyTorch module."""
    B, T, F = x.shape
    n_layers = len(params["layers"])
    H = params["layers"][0][1].shape[0]
    O = params["fc_w"].shape[0]

    # ---- VMEM-aware batch tile ------------------------------------------------
    per_sample_bytes = 4 * (2 * T * F                      # x block, dbl-buffered
                            + T * H                        # xw0 scratch
                            + (T * H if use_all_h else 0)  # last-layer scratch
                            + 4 * n_layers * H)            # live states + slack
    per_sample_bytes = int(per_sample_bytes * 1.5)
    w_bytes = 0
    for (w_ih, w_hh, b_ih, _b_hh) in params["layers"]:
        w_bytes += 4 * (w_ih.size + w_hh.size + b_ih.size)
    w_bytes += 4 * (params["fc_w"].size + params["fc_b"].size)
    w_bytes *= 2   # default double-buffering of the (invariant) weight inputs
    # TODO(synk): pipeline_mode=pl.Buffered(1) on the invariant weight specs
    # would reclaim the second buffer on 64 MiB-VMEM parts.
    vmem_cap = _vmem_capacity_bytes()
    budget = max(int(0.4 * vmem_cap) - w_bytes, 8 * 1024)
    bb = _batch_block(B, per_sample_bytes, budget)

    # ---- Build kernel args (time-major input, pre-transposed weights) --------
    x_tm = jnp.transpose(x, (1, 0, 2))                     # (T, B, F)
    args = [x_tm]
    in_specs = [pl.BlockSpec((T, bb, F), lambda i: (0, i, 0))]

    for (w_ih, w_hh, b_ih, b_hh) in params["layers"]:
        wih_t = w_ih.T                                     # (F_l, H)
        whh_t = w_hh.T                                     # (H, H)
        b = (b_ih + b_hh).reshape(1, -1)                   # (1, H)
        args += [wih_t, whh_t, b]
        in_specs += [_full_spec(wih_t.shape), _full_spec(whh_t.shape),
                     _full_spec(b.shape)]

    if use_all_h:
        # PyTorch flattens output.reshape(B, -1) in (t, h) order:
        # fc_w (O, T*H) -> fc_w.T reshaped to (T, H, O).
        fc_w = params["fc_w"].T.reshape(T, H, O)
    else:
        fc_w = params["fc_w"].T                            # (H, O)
    fc_b = params["fc_b"].reshape(1, -1)                   # (1, O)
    args += [fc_w, fc_b]
    in_specs += [_full_spec(fc_w.shape), _full_spec(fc_b.shape)]

    scratch_shapes = [pltpu.VMEM((T, bb, H), jnp.float32)]       # xw0
    if use_all_h:
        scratch_shapes.append(pltpu.VMEM((T, bb, H), jnp.float32))  # last-layer h

    # Raise the scoped VMEM limit only when the estimated footprint needs it.
    est_total = w_bytes + bb * per_sample_bytes
    cp_kwargs = dict(dimension_semantics=("parallel",))
    if est_total > 30 * 1024 * 1024:
        cp_kwargs["vmem_limit_bytes"] = min(int(0.9 * vmem_cap),
                                            est_total + (8 << 20))

    kernel = functools.partial(_trad_rnn_kernel,
                               n_layers=n_layers, use_all_h=use_all_h)

    return pl.pallas_call(
        kernel,
        out_shape=jax.ShapeDtypeStruct((B, O), jnp.float32),
        grid=(pl.cdiv(B, bb),),
        in_specs=in_specs,
        out_specs=pl.BlockSpec((bb, O), lambda i: (i, 0)),
        scratch_shapes=scratch_shapes,
        compiler_params=pltpu.CompilerParams(**cp_kwargs),
    )(*args)


# --------------------------- Params / reference ----------------------------- #

def init_trad_rnn_params(key, input_size, hidden_size, n_layers, output_size,
                         seq_len, use_all_h=True):
    """Deterministic params mirroring nn.RNN / nn.Linear shapes & init ranges."""
    params = {"layers": []}
    k_rnn = 1.0 / jnp.sqrt(hidden_size)
    for l in range(n_layers):
        in_f = input_size if l == 0 else hidden_size
        key, k1, k2, k3, k4 = jax.random.split(key, 5)
        w_ih = jax.random.uniform(k1, (hidden_size, in_f), jnp.float32, -k_rnn, k_rnn)
        w_hh = jax.random.uniform(k2, (hidden_size, hidden_size), jnp.float32, -k_rnn, k_rnn)
        b_ih = jax.random.uniform(k3, (hidden_size,), jnp.float32, -k_rnn, k_rnn)
        b_hh = jax.random.uniform(k4, (hidden_size,), jnp.float32, -k_rnn, k_rnn)
        params["layers"].append((w_ih, w_hh, b_ih, b_hh))
    fc_in = hidden_size * seq_len if use_all_h else hidden_size
    k_fc = 1.0 / jnp.sqrt(fc_in)
    key, k5, k6 = jax.random.split(key, 3)
    params["fc_w"] = jax.random.uniform(k5, (output_size, fc_in), jnp.float32, -k_fc, k_fc)
    params["fc_b"] = jax.random.uniform(k6, (output_size,), jnp.float32, -k_fc, k_fc)
    return params


def trad_rnn_reference(params, x, use_all_h=True):
    """Pure-JAX reference mirroring torch.nn.RNN (eval) + Linear."""
    B, T, _ = x.shape
    h_seq = jnp.transpose(x, (1, 0, 2))
    for (w_ih, w_hh, b_ih, b_hh) in params["layers"]:
        H = w_hh.shape[0]

        def step(h, x_t, w_ih=w_ih, w_hh=w_hh, b_ih=b_ih, b_hh=b_hh):
            h_new = jnp.tanh(x_t @ w_ih.T + b_ih + h @ w_hh.T + b_hh)
            return h_new, h_new

        _, h_seq = lax.scan(step, jnp.zeros((B, H), jnp.float32), h_seq)
    out_bth = jnp.transpose(h_seq, (1, 0, 2))
    flat = out_bth.reshape(B, -1) if use_all_h else out_bth[:, -1, :]
    return flat @ params["fc_w"].T + params["fc_b"]


# ----------------------------------- main ----------------------------------- #

if __name__ == "__main__":
    input_size, hidden_size, n_layers, output_size, seq_len = 4, 32, 2, 1, 8
    batch = 2

    key = jax.random.PRNGKey(0)
    key, pkey, xkey = jax.random.split(key, 3)
    params = init_trad_rnn_params(pkey, input_size, hidden_size, n_layers,
                                  output_size, seq_len, use_all_h=True)
    x = jax.random.normal(xkey, (batch, seq_len, input_size), jnp.float32)

    out = trad_rnn_forward(params, x, use_all_h=True)
    out = jax.block_until_ready(out)

    ref = trad_rnn_reference(params, x, use_all_h=True)
    assert out.shape == (batch, output_size), out.shape
    assert jnp.allclose(out, ref, atol=1e-4, rtol=1e-4), (out, ref)

    print("KERNEL_OK")
</pallas_src>

<mosaic_0001>
module attributes {stable_mosaic.version = 11 : i64} {
  func.func @_trad_rnn_kernel(%arg0: i32, %arg1: memref<8x2x4xf32, #tpu.memory_space<vmem>>, %arg2: memref<4x32xf32, #tpu.memory_space<vmem>>, %arg3: memref<32x32xf32, #tpu.memory_space<vmem>>, %arg4: memref<1x32xf32, #tpu.memory_space<vmem>>, %arg5: memref<32x32xf32, #tpu.memory_space<vmem>>, %arg6: memref<32x32xf32, #tpu.memory_space<vmem>>, %arg7: memref<1x32xf32, #tpu.memory_space<vmem>>, %arg8: memref<8x32x1xf32, #tpu.memory_space<vmem>>, %arg9: memref<1x1xf32, #tpu.memory_space<vmem>>, %arg10: memref<2x1xf32, #tpu.memory_space<vmem>>, %arg11: memref<8x2x32xf32, #tpu.memory_space<vmem>>, %arg12: memref<8x2x32xf32, #tpu.memory_space<vmem>>) attributes {dimension_semantics = [#tpu.dimension_semantics<parallel>], iteration_bounds = array<i64: 1>, scalar_prefetch = 0 : i64, scratch_operands = 2 : i64, tpu.core_type = #tpu.core_type<tc>, window_params = [{transform_indices = @transform_0, window_bounds = array<i64: 8, 2, 4>}, {pipeline_mode = #tpu.pipeline_mode<synchronous>, transform_indices = @transform_1, window_bounds = array<i64: 4, 32>}, {pipeline_mode = #tpu.pipeline_mode<synchronous>, transform_indices = @transform_2, window_bounds = array<i64: 32, 32>}, {pipeline_mode = #tpu.pipeline_mode<synchronous>, transform_indices = @transform_3, window_bounds = array<i64: 1, 32>}, {pipeline_mode = #tpu.pipeline_mode<synchronous>, transform_indices = @transform_4, window_bounds = array<i64: 32, 32>}, {pipeline_mode = #tpu.pipeline_mode<synchronous>, transform_indices = @transform_5, window_bounds = array<i64: 32, 32>}, {pipeline_mode = #tpu.pipeline_mode<synchronous>, transform_indices = @transform_6, window_bounds = array<i64: 1, 32>}, {pipeline_mode = #tpu.pipeline_mode<synchronous>, transform_indices = @transform_7, window_bounds = array<i64: 8, 32, 1>}, {pipeline_mode = #tpu.pipeline_mode<synchronous>, transform_indices = @transform_8, window_bounds = array<i64: 1, 1>}, {transform_indices = @transform_9, window_bounds = array<i64: 2, 1>}]} {
    %c0 = arith.constant 0 : index
    %c0_0 = arith.constant 0 : index
    %0 = vector.load %arg2[%c0, %c0_0] : memref<4x32xf32, #tpu.memory_space<vmem>>, vector<4x32xf32>
    %c0_1 = arith.constant 0 : index
    %c0_2 = arith.constant 0 : index
    %1 = vector.load %arg5[%c0_1, %c0_2] : memref<32x32xf32, #tpu.memory_space<vmem>>, vector<32x32xf32>
    %c0_3 = arith.constant 0 : index
    %c0_4 = arith.constant 0 : index
    %2 = vector.load %arg3[%c0_3, %c0_4] : memref<32x32xf32, #tpu.memory_space<vmem>>, vector<32x32xf32>
    %c0_5 = arith.constant 0 : index
    %c0_6 = arith.constant 0 : index
    %3 = vector.load %arg6[%c0_5, %c0_6] : memref<32x32xf32, #tpu.memory_space<vmem>>, vector<32x32xf32>
    %c0_7 = arith.constant 0 : index
    %c0_8 = arith.constant 0 : index
    %4 = vector.load %arg4[%c0_7, %c0_8] : memref<1x32xf32, #tpu.memory_space<vmem>>, vector<1x32xf32>
    %c0_9 = arith.constant 0 : index
    %c0_10 = arith.constant 0 : index
    %5 = vector.load %arg7[%c0_9, %c0_10] : memref<1x32xf32, #tpu.memory_space<vmem>>, vector<1x32xf32>
    %c0_11 = arith.constant 0 : index
    %c0_12 = arith.constant 0 : index
    %c0_13 = arith.constant 0 : index
    %6 = vector.load %arg1[%c0_11, %c0_12, %c0_13] : memref<8x2x4xf32, #tpu.memory_space<vmem>>, vector<8x2x4xf32>
    %7 = vector.shape_cast %6 : vector<8x2x4xf32> to vector<16x4xf32>
    %cst = arith.constant dense<0.000000e+00> : vector<16x32xf32>
    %8 = tpu.matmul %7, %0, %cst {dimension_numbers = #tpu.dot_dimension_numbers<[1], [0], [0], [1], [0, 0, 1, 1], [], []>} : vector<16x4xf32>, vector<4x32xf32>, vector<16x32xf32> -> vector<16x32xf32>
    %9 = vector.shape_cast %8 : vector<16x32xf32> to vector<8x2x32xf32>
    %10 = vector.shape_cast %4 : vector<1x32xf32> to vector<1x1x32xf32>
    %11 = vector.broadcast %10 : vector<1x1x32xf32> to vector<8x2x32xf32>
    %12 = arith.addf %9, %11 : vector<8x2x32xf32>
    %c0_14 = arith.constant 0 : index
    %c0_15 = arith.constant 0 : index
    %c0_16 = arith.constant 0 : index
    %13 = vector.load %arg11[%c0_14, %c0_15, %c0_16] : memref<8x2x32xf32, #tpu.memory_space<vmem>>, vector<8x2x32xf32>
    tpu.vector_store %arg11[%c0_14, %c0_15, %c0_16], %12 {strides = array<i32>} : memref<8x2x32xf32, #tpu.memory_space<vmem>>, vector<8x2x32xf32>,
    %c0_17 = arith.constant 0 : index
    %c0_18 = arith.constant 0 : index
    %c0_19 = arith.constant 0 : index
    %14 = vector.load %arg11[%c0_17, %c0_18, %c0_19] : memref<8x2x32xf32, #tpu.memory_space<vmem>>, vector<1x2x32xf32>
    %15 = vector.shape_cast %14 : vector<1x2x32xf32> to vector<2x32xf32>
    %16 = math.tanh %15 : vector<2x32xf32>
    %c1 = arith.constant 1 : index
    %c0_20 = arith.constant 0 : index
    %c0_21 = arith.constant 0 : index
    %17 = vector.load %arg11[%c1, %c0_20, %c0_21] : memref<8x2x32xf32, #tpu.memory_space<vmem>>, vector<1x2x32xf32>
    %18 = vector.shape_cast %17 : vector<1x2x32xf32> to vector<2x32xf32>
    %cst_22 = arith.constant dense<0.000000e+00> : vector<2x32xf32>
    %19 = tpu.matmul %16, %2, %cst_22 {dimension_numbers = #tpu.dot_dimension_numbers<[1], [0], [0], [1], [0, 0, 1, 1], [], []>} : vector<2x32xf32>, vector<32x32xf32>, vector<2x32xf32> -> vector<2x32xf32>
    %20 = arith.addf %18, %19 : vector<2x32xf32>
    %21 = math.tanh %20 : vector<2x32xf32>
    %cst_23 = arith.constant dense<0.000000e+00> : vector<2x32xf32>
    %22 = tpu.matmul %16, %1, %cst_23 {dimension_numbers = #tpu.dot_dimension_numbers<[1], [0], [0], [1], [0, 0, 1, 1], [], []>} : vector<2x32xf32>, vector<32x32xf32>, vector<2x32xf32> -> vector<2x32xf32>
    %23 = vector.broadcast %5 : vector<1x32xf32> to vector<2x32xf32>
    %24 = arith.addf %22, %23 : vector<2x32xf32>
    %25 = math.tanh %24 : vector<2x32xf32>
    %c0_24 = arith.constant 0 : index
    %c0_25 = arith.constant 0 : index
    %c0_26 = arith.constant 0 : index
    %26 = vector.load %arg12[%c0_24, %c0_25, %c0_26] : memref<8x2x32xf32, #tpu.memory_space<vmem>>, vector<1x2x32xf32>
    %27 = vector.shape_cast %26 : vector<1x2x32xf32> to vector<2x32xf32>
    %28 = vector.shape_cast %25 : vector<2x32xf32> to vector<1x2x32xf32>
    tpu.vector_store %arg12[%c0_24, %c0_25, %c0_26], %28 {strides = array<i32>} : memref<8x2x32xf32, #tpu.memory_space<vmem>>, vector<1x2x32xf32>,
    %c2 = arith.constant 2 : index
    %c0_27 = arith.constant 0 : index
    %c0_28 = arith.constant 0 : index
    %29 = vector.load %arg11[%c2, %c0_27, %c0_28] : memref<8x2x32xf32, #tpu.memory_space<vmem>>, vector<1x2x32xf32>
    %30 = vector.shape_cast %29 : vector<1x2x32xf32> to vector<2x32xf32>
    %cst_29 = arith.constant dense<0.000000e+00> : vector<2x32xf32>
    %31 = tpu.matmul %21, %2, %cst_29 {dimension_numbers = #tpu.dot_dimension_numbers<[1], [0], [0], [1], [0, 0, 1, 1], [], []>} : vector<2x32xf32>, vector<32x32xf32>, vector<2x32xf32> -> vector<2x32xf32>
    %32 = arith.addf %30, %31 : vector<2x32xf32>
    %33 = math.tanh %32 : vector<2x32xf32>
    %cst_30 = arith.constant dense<0.000000e+00> : vector<2x32xf32>
    %34 = tpu.matmul %21, %1, %cst_30 {dimension_numbers = #tpu.dot_dimension_numbers<[1], [0], [0], [1], [0, 0, 1, 1], [], []>} : vector<2x32xf32>, vector<32x32xf32>, vector<2x32xf32> -> vector<2x32xf32>
    %35 = vector.broadcast %5 : vector<1x32xf32> to vector<2x32xf32>
    %36 = arith.addf %34, %35 : vector<2x32xf32>
    %cst_31 = arith.constant dense<0.000000e+00> : vector<2x32xf32>
    %37 = tpu.matmul %25, %3, %cst_31 {dimension_numbers = #tpu.dot_dimension_numbers<[1], [0], [0], [1], [0, 0, 1, 1], [], []>} : vector<2x32xf32>, vector<32x32xf32>, vector<2x32xf32> -> vector<2x32xf32>
    %38 = arith.addf %36, %37 : vector<2x32xf32>
    %39 = math.tanh %38 : vector<2x32xf32>
    %c1_32 = arith.constant 1 : index
    %c0_33 = arith.constant 0 : index
    %c0_34 = arith.constant 0 : index
    %40 = vector.load %arg12[%c1_32, %c0_33, %c0_34] : memref<8x2x32xf32, #tpu.memory_space<vmem>>, vector<1x2x32xf32>
    %41 = vector.shape_cast %40 : vector<1x2x32xf32> to vector<2x32xf32>
    %42 = vector.shape_cast %39 : vector<2x32xf32> to vector<1x2x32xf32>
    tpu.vector_store %arg12[%c1_32, %c0_33, %c0_34], %42 {strides = array<i32>} : memref<8x2x32xf32, #tpu.memory_space<vmem>>, vector<1x2x32xf32>,
    %c3 = arith.constant 3 : index
    %c0_35 = arith.constant 0 : index
    %c0_36 = arith.constant 0 : index
    %43 = vector.load %arg11[%c3, %c0_35, %c0_36] : memref<8x2x32xf32, #tpu.memory_space<vmem>>, vector<1x2x32xf32>
    %44 = vector.shape_cast %43 : vector<1x2x32xf32> to vector<2x32xf32>
    %cst_37 = arith.constant dense<0.000000e+00> : vector<2x32xf32>
    %45 = tpu.matmul %33, %2, %cst_37 {dimension_numbers = #tpu.dot_dimension_numbers<[1], [0], [0], [1], [0, 0, 1, 1], [], []>} : vector<2x32xf32>, vector<32x32xf32>, vector<2x32xf32> -> vector<2x32xf32>
    %46 = arith.addf %44, %45 : vector<2x32xf32>
    %47 = math.tanh %46 : vector<2x32xf32>
    %cst_38 = arith.constant dense<0.000000e+00> : vector<2x32xf32>
    %48 = tpu.matmul %33, %1, %cst_38 {dimension_numbers = #tpu.dot_dimension_numbers<[1], [0], [0], [1], [0, 0, 1, 1], [], []>} : vector<2x32xf32>, vector<32x32xf32>, vector<2x32xf32> -> vector<2x32xf32>
    %49 = vector.broadcast %5 : vector<1x32xf32> to vector<2x32xf32>
    %50 = arith.addf %48, %49 : vector<2x32xf32>
    %cst_39 = arith.constant dense<0.000000e+00> : vector<2x32xf32>
    %51 = tpu.matmul %39, %3, %cst_39 {dimension_numbers = #tpu.dot_dimension_numbers<[1], [0], [0], [1], [0, 0, 1, 1], [], []>} : vector<2x32xf32>, vector<32x32xf32>, vector<2x32xf32> -> vector<2x32xf32>
    %52 = arith.addf %50, %51 : vector<2x32xf32>
    %53 = math.tanh %52 : vector<2x32xf32>
    %c2_40 = arith.constant 2 : index
    %c0_41 = arith.constant 0 : index
    %c0_42 = arith.constant 0 : index
    %54 = vector.load %arg12[%c2_40, %c0_41, %c0_42] : memref<8x2x32xf32, #tpu.memory_space<vmem>>, vector<1x2x32xf32>
    %55 = vector.shape_cast %54 : vector<1x2x32xf32> to vector<2x32xf32>
    %56 = vector.shape_cast %53 : vector<2x32xf32> to vector<1x2x32xf32>
    tpu.vector_store %arg12[%c2_40, %c0_41, %c0_42], %56 {strides = array<i32>} : memref<8x2x32xf32, #tpu.memory_space<vmem>>, vector<1x2x32xf32>,
    %c4 = arith.constant 4 : index
    %c0_43 = arith.constant 0 : index
    %c0_44 = arith.constant 0 : index
    %57 = vector.load %arg11[%c4, %c0_43, %c0_44] : memref<8x2x32xf32, #tpu.memory_space<vmem>>, vector<1x2x32xf32>
    %58 = vector.shape_cast %57 : vector<1x2x32xf32> to vector<2x32xf32>
    %cst_45 = arith.constant dense<0.000000e+00> : vector<2x32xf32>
    %59 = tpu.matmul %47, %2, %cst_45 {dimension_numbers = #tpu.dot_dimension_numbers<[1], [0], [0], [1], [0, 0, 1, 1], [], []>} : vector<2x32xf32>, vector<32x32xf32>, vector<2x32xf32> -> vector<2x32xf32>
    %60 = arith.addf %58, %59 : vector<2x32xf32>
    %61 = math.tanh %60 : vector<2x32xf32>
    %cst_46 = arith.constant dense<0.000000e+00> : vector<2x32xf32>
    %62 = tpu.matmul %47, %1, %cst_46 {dimension_numbers = #tpu.dot_dimension_numbers<[1], [0], [0], [1], [0, 0, 1, 1], [], []>} : vector<2x32xf32>, vector<32x32xf32>, vector<2x32xf32> -> vector<2x32xf32>
    %63 = vector.broadcast %5 : vector<1x32xf32> to vector<2x32xf32>
    %64 = arith.addf %62, %63 : vector<2x32xf32>
    %cst_47 = arith.constant dense<0.000000e+00> : vector<2x32xf32>
    %65 = tpu.matmul %53, %3, %cst_47 {dimension_numbers = #tpu.dot_dimension_numbers<[1], [0], [0], [1], [0, 0, 1, 1], [], []>} : vector<2x32xf32>, vector<32x32xf32>, vector<2x32xf32> -> vector<2x32xf32>
    %66 = arith.addf %64, %65 : vector<2x32xf32>
    %67 = math.tanh %66 : vector<2x32xf32>
    %c3_48 = arith.constant 3 : index
    %c0_49 = arith.constant 0 : index
    %c0_50 = arith.constant 0 : index
    %68 = vector.load %arg12[%c3_48, %c0_49, %c0_50] : memref<8x2x32xf32, #tpu.memory_space<vmem>>, vector<1x2x32xf32>
    %69 = vector.shape_cast %68 : vector<1x2x32xf32> to vector<2x32xf32>
    %70 = vector.shape_cast %67 : vector<2x32xf32> to vector<1x2x32xf32>
    tpu.vector_store %arg12[%c3_48, %c0_49, %c0_50], %70 {strides = array<i32>} : memref<8x2x32xf32, #tpu.memory_space<vmem>>, vector<1x2x32xf32>,
    %c5 = arith.constant 5 : index
    %c0_51 = arith.constant 0 : index
    %c0_52 = arith.constant 0 : index
    %71 = vector.load %arg11[%c5, %c0_51, %c0_52] : memref<8x2x32xf32, #tpu.memory_space<vmem>>, vector<1x2x32xf32>
    %72 = vector.shape_cast %71 : vector<1x2x32xf32> to vector<2x32xf32>
    %cst_53 = arith.constant dense<0.000000e+00> : vector<2x32xf32>
    %73 = tpu.matmul %61, %2, %cst_53 {dimension_numbers = #tpu.dot_dimension_numbers<[1], [0], [0], [1], [0, 0, 1, 1], [], []>} : vector<2x32xf32>, vector<32x32xf32>, vector<2x32xf32> -> vector<2x32xf32>
    %74 = arith.addf %72, %73 : vector<2x32xf32>
    %75 = math.tanh %74 : vector<2x32xf32>
    %cst_54 = arith.constant dense<0.000000e+00> : vector<2x32xf32>
    %76 = tpu.matmul %61, %1, %cst_54 {dimension_numbers = #tpu.dot_dimension_numbers<[1], [0], [0], [1], [0, 0, 1, 1], [], []>} : vector<2x32xf32>, vector<32x32xf32>, vector<2x32xf32> -> vector<2x32xf32>
    %77 = vector.broadcast %5 : vector<1x32xf32> to vector<2x32xf32>
    %78 = arith.addf %76, %77 : vector<2x32xf32>
    %cst_55 = arith.constant dense<0.000000e+00> : vector<2x32xf32>
    %79 = tpu.matmul %67, %3, %cst_55 {dimension_numbers = #tpu.dot_dimension_numbers<[1], [0], [0], [1], [0, 0, 1, 1], [], []>} : vector<2x32xf32>, vector<32x32xf32>, vector<2x32xf32> -> vector<2x32xf32>
    %80 = arith.addf %78, %79 : vector<2x32xf32>
    %81 = math.tanh %80 : vector<2x32xf32>
    %c4_56 = arith.constant 4 : index
    %c0_57 = arith.constant 0 : index
    %c0_58 = arith.constant 0 : index
    %82 = vector.load %arg12[%c4_56, %c0_57, %c0_58] : memref<8x2x32xf32, #tpu.memory_space<vmem>>, vector<1x2x32xf32>
    %83 = vector.shape_cast %82 : vector<1x2x32xf32> to vector<2x32xf32>
    %84 = vector.shape_cast %81 : vector<2x32xf32> to vector<1x2x32xf32>
    tpu.vector_store %arg12[%c4_56, %c0_57, %c0_58], %84 {strides = array<i32>} : memref<8x2x32xf32, #tpu.memory_space<vmem>>, vector<1x2x32xf32>,
    %c6 = arith.constant 6 : index
    %c0_59 = arith.constant 0 : index
    %c0_60 = arith.constant 0 : index
    %85 = vector.load %arg11[%c6, %c0_59, %c0_60] : memref<8x2x32xf32, #tpu.memory_space<vmem>>, vector<1x2x32xf32>
    %86 = vector.shape_cast %85 : vector<1x2x32xf32> to vector<2x32xf32>
    %cst_61 = arith.constant dense<0.000000e+00> : vector<2x32xf32>
    %87 = tpu.matmul %75, %2, %cst_61 {dimension_numbers = #tpu.dot_dimension_numbers<[1], [0], [0], [1], [0, 0, 1, 1], [], []>} : vector<2x32xf32>, vector<32x32xf32>, vector<2x32xf32> -> vector<2x32xf32>
    %88 = arith.addf %86, %87 : vector<2x32xf32>
    %89 = math.tanh %88 : vector<2x32xf32>
    %cst_62 = arith.constant dense<0.000000e+00> : vector<2x32xf32>
    %90 = tpu.matmul %75, %1, %cst_62 {dimension_numbers = #tpu.dot_dimension_numbers<[1], [0], [0], [1], [0, 0, 1, 1], [], []>} : vector<2x32xf32>, vector<32x32xf32>, vector<2x32xf32> -> vector<2x32xf32>
    %91 = vector.broadcast %5 : vector<1x32xf32> to vector<2x32xf32>
    %92 = arith.addf %90, %91 : vector<2x32xf32>
    %cst_63 = arith.constant dense<0.000000e+00> : vector<2x32xf32>
    %93 = tpu.matmul %81, %3, %cst_63 {dimension_numbers = #tpu.dot_dimension_numbers<[1], [0], [0], [1], [0, 0, 1, 1], [], []>} : vector<2x32xf32>, vector<32x32xf32>, vector<2x32xf32> -> vector<2x32xf32>
    %94 = arith.addf %92, %93 : vector<2x32xf32>
    %95 = math.tanh %94 : vector<2x32xf32>
    %c5_64 = arith.constant 5 : index
    %c0_65 = arith.constant 0 : index
    %c0_66 = arith.constant 0 : index
    %96 = vector.load %arg12[%c5_64, %c0_65, %c0_66] : memref<8x2x32xf32, #tpu.memory_space<vmem>>, vector<1x2x32xf32>
    %97 = vector.shape_cast %96 : vector<1x2x32xf32> to vector<2x32xf32>
    %98 = vector.shape_cast %95 : vector<2x32xf32> to vector<1x2x32xf32>
    tpu.vector_store %arg12[%c5_64, %c0_65, %c0_66], %98 {strides = array<i32>} : memref<8x2x32xf32, #tpu.memory_space<vmem>>, vector<1x2x32xf32>,
    %c7 = arith.constant 7 : index
    %c0_67 = arith.constant 0 : index
    %c0_68 = arith.constant 0 : index
    %99 = vector.load %arg11[%c7, %c0_67, %c0_68] : memref<8x2x32xf32, #tpu.memory_space<vmem>>, vector<1x2x32xf32>
    %100 = vector.shape_cast %99 : vector<1x2x32xf32> to vector<2x32xf32>
    %cst_69 = arith.constant dense<0.000000e+00> : vector<2x32xf32>
    %101 = tpu.matmul %89, %2, %cst_69 {dimension_numbers = #tpu.dot_dimension_numbers<[1], [0], [0], [1], [0, 0, 1, 1], [], []>} : vector<2x32xf32>, vector<32x32xf32>, vector<2x32xf32> -> vector<2x32xf32>
    %102 = arith.addf %100, %101 : vector<2x32xf32>
    %103 = math.tanh %102 : vector<2x32xf32>
    %cst_70 = arith.constant dense<0.000000e+00> : vector<2x32xf32>
    %104 = tpu.matmul %89, %1, %cst_70 {dimension_numbers = #tpu.dot_dimension_numbers<[1], [0], [0], [1], [0, 0, 1, 1], [], []>} : vector<2x32xf32>, vector<32x32xf32>, vector<2x32xf32> -> vector<2x32xf32>
    %105 = vector.broadcast %5 : vector<1x32xf32> to vector<2x32xf32>
    %106 = arith.addf %104, %105 : vector<2x32xf32>
    %cst_71 = arith.constant dense<0.000000e+00> : vector<2x32xf32>
    %107 = tpu.matmul %95, %3, %cst_71 {dimension_numbers = #tpu.dot_dimension_numbers<[1], [0], [0], [1], [0, 0, 1, 1], [], []>} : vector<2x32xf32>, vector<32x32xf32>, vector<2x32xf32> -> vector<2x32xf32>
    %108 = arith.addf %106, %107 : vector<2x32xf32>
    %109 = math.tanh %108 : vector<2x32xf32>
    %c6_72 = arith.constant 6 : index
    %c0_73 = arith.constant 0 : index
    %c0_74 = arith.constant 0 : index
    %110 = vector.load %arg12[%c6_72, %c0_73, %c0_74] : memref<8x2x32xf32, #tpu.memory_space<vmem>>, vector<1x2x32xf32>
    %111 = vector.shape_cast %110 : vector<1x2x32xf32> to vector<2x32xf32>
    %112 = vector.shape_cast %109 : vector<2x32xf32> to vector<1x2x32xf32>
    tpu.vector_store %arg12[%c6_72, %c0_73, %c0_74], %112 {strides = array<i32>} : memref<8x2x32xf32, #tpu.memory_space<vmem>>, vector<1x2x32xf32>,
    %cst_75 = arith.constant dense<0.000000e+00> : vector<2x32xf32>
    %113 = tpu.matmul %103, %1, %cst_75 {dimension_numbers = #tpu.dot_dimension_numbers<[1], [0], [0], [1], [0, 0, 1, 1], [], []>} : vector<2x32xf32>, vector<32x32xf32>, vector<2x32xf32> -> vector<2x32xf32>
    %114 = vector.broadcast %5 : vector<1x32xf32> to vector<2x32xf32>
    %115 = arith.addf %113, %114 : vector<2x32xf32>
    %cst_76 = arith.constant dense<0.000000e+00> : vector<2x32xf32>
    %116 = tpu.matmul %109, %3, %cst_76 {dimension_numbers = #tpu.dot_dimension_numbers<[1], [0], [0], [1], [0, 0, 1, 1], [], []>} : vector<2x32xf32>, vector<32x32xf32>, vector<2x32xf32> -> vector<2x32xf32>
    %117 = arith.addf %115, %116 : vector<2x32xf32>
    %118 = math.tanh %117 : vector<2x32xf32>
    %c7_77 = arith.constant 7 : index
    %c0_78 = arith.constant 0 : index
    %c0_79 = arith.constant 0 : index
    %119 = vector.load %arg12[%c7_77, %c0_78, %c0_79] : memref<8x2x32xf32, #tpu.memory_space<vmem>>, vector<1x2x32xf32>
    %120 = vector.shape_cast %119 : vector<1x2x32xf32> to vector<2x32xf32>
    %121 = vector.shape_cast %118 : vector<2x32xf32> to vector<1x2x32xf32>
    tpu.vector_store %arg12[%c7_77, %c0_78, %c0_79], %121 {strides = array<i32>} : memref<8x2x32xf32, #tpu.memory_space<vmem>>, vector<1x2x32xf32>,
    %c0_80 = arith.constant 0 : index
    %c0_81 = arith.constant 0 : index
    %122 = vector.load %arg9[%c0_80, %c0_81] : memref<1x1xf32, #tpu.memory_space<vmem>>, vector<1x1xf32>
    %c0_82 = arith.constant 0 : index
    %c0_83 = arith.constant 0 : index
    %c0_84 = arith.constant 0 : index
    %123 = vector.load %arg12[%c0_82, %c0_83, %c0_84] : memref<8x2x32xf32, #tpu.memory_space<vmem>>, vector<8x2x32xf32>
    %c0_85 = arith.constant 0 : index
    %c0_86 = arith.constant 0 : index
    %c0_87 = arith.constant 0 : index
    %124 = vector.load %arg8[%c0_85, %c0_86, %c0_87] : memref<8x32x1xf32, #tpu.memory_space<vmem>>, vector<8x32x1xf32>
    %cst_88 = arith.constant dense<0.000000e+00> : vector<8x2x1xf32>
    %125 = tpu.matmul %123, %124, %cst_88 {dimension_numbers = #tpu.dot_dimension_numbers<[2], [1], [1], [2], [0, 0, 0, 1, 1, 2], [0], [0]>} : vector<8x2x32xf32>, vector<8x32x1xf32>, vector<8x2x1xf32> -> vector<8x2x1xf32>
    %cst_89 = arith.constant dense<0.000000e+00> : vector<2x1xf32>
    %126 = vector.multi_reduction <add>, %125, %cst_89 [0] : vector<8x2x1xf32> to vector<2x1xf32>
    %127 = vector.broadcast %122 : vector<1x1xf32> to vector<2x1xf32>
    %128 = arith.addf %126, %127 : vector<2x1xf32>
    %c0_90 = arith.constant 0 : index
    %c0_91 = arith.constant 0 : index
    %129 = vector.load %arg10[%c0_90, %c0_91] : memref<2x1xf32, #tpu.memory_space<vmem>>, vector<2x1xf32>
    tpu.vector_store %arg10[%c0_90, %c0_91], %128 {strides = array<i32>} : memref<2x1xf32, #tpu.memory_space<vmem>>, vector<2x1xf32>,
    return
  }
  func.func @transform_0(%arg0: i32) -> (i32, i32, i32) {
    %c0_i32 = arith.constant 0 : i32
    %c0_i32_0 = arith.constant 0 : i32
    %c0_i32_1 = arith.constant 0 : i32
    return %c0_i32, %arg0, %c0_i32_0 : i32, i32, i32
  }
  func.func @transform_1(%arg0: i32) -> (i32, i32) {
    %c0_i32 = arith.constant 0 : i32
    %c0_i32_0 = arith.constant 0 : i32
    %c0_i32_1 = arith.constant 0 : i32
    return %c0_i32, %c0_i32_0 : i32, i32
  }
  func.func @transform_2(%arg0: i32) -> (i32, i32) {
    %c0_i32 = arith.constant 0 : i32
    %c0_i32_0 = arith.constant 0 : i32
    %c0_i32_1 = arith.constant 0 : i32
    return %c0_i32, %c0_i32_0 : i32, i32
  }
  func.func @transform_3(%arg0: i32) -> (i32, i32) {
    %c0_i32 = arith.constant 0 : i32
    %c0_i32_0 = arith.constant 0 : i32
    %c0_i32_1 = arith.constant 0 : i32
    return %c0_i32, %c0_i32_0 : i32, i32
  }
  func.func @transform_4(%arg0: i32) -> (i32, i32) {
    %c0_i32 = arith.constant 0 : i32
    %c0_i32_0 = arith.constant 0 : i32
    %c0_i32_1 = arith.constant 0 : i32
    return %c0_i32, %c0_i32_0 : i32, i32
  }
  func.func @transform_5(%arg0: i32) -> (i32, i32) {
    %c0_i32 = arith.constant 0 : i32
    %c0_i32_0 = arith.constant 0 : i32
    %c0_i32_1 = arith.constant 0 : i32
    return %c0_i32, %c0_i32_0 : i32, i32
  }
  func.func @transform_6(%arg0: i32) -> (i32, i32) {
    %c0_i32 = arith.constant 0 : i32
    %c0_i32_0 = arith.constant 0 : i32
    %c0_i32_1 = arith.constant 0 : i32
    return %c0_i32, %c0_i32_0 : i32, i32
  }
  func.func @transform_7(%arg0: i32) -> (i32, i32, i32) {
    %c0_i32 = arith.constant 0 : i32
    %c0_i32_0 = arith.constant 0 : i32
    %c0_i32_1 = arith.constant 0 : i32
    %c0_i32_2 = arith.constant 0 : i32
    return %c0_i32, %c0_i32_0, %c0_i32_1 : i32, i32, i32
  }
  func.func @transform_8(%arg0: i32) -> (i32, i32) {
    %c0_i32 = arith.constant 0 : i32
    %c0_i32_0 = arith.constant 0 : i32
    %c0_i32_1 = arith.constant 0 : i32
    return %c0_i32, %c0_i32_0 : i32, i32
  }
  func.func @transform_9(%arg0: i32) -> (i32, i32) {
    %c0_i32 = arith.constant 0 : i32
    %c0_i32_0 = arith.constant 0 : i32
    return %arg0, %c0_i32 : i32, i32
  }
}

</mosaic_0001>

<bundles_post_ra>
// kernel: trad_rnn_forward.1
= control target key start
LH: loop header
LB: loop body
LE: loop exit
PB: predicated region body
PF: predicated region fallthrough
CT: control target
= control target key end

     0   :  { %vm87_vm0 = vcmask 1043456   ;;  %vm82_vm1 = vcmask 31744   ;;  %vm139_vm2 = vcmask 254976   ;;  %vm152_vm3 = vcmask 261120   ;;  %s1425_s1 = inlined_call_operand.vmem [shape: f32[4,32], index: 1, kind: input, shape index: {}]   ;;  %s1426_s0 = inlined_call_operand.vmem [shape: f32[8,2,4], index: 0, kind: input, shape index: {}]   ;;  %s1427_s3 = inlined_call_operand.vmem [shape: f32[1,32], index: 3, kind: input, shape index: {}]   ;;  %s1428_s2 = inlined_call_operand.vmem [shape: f32[32,32], index: 2, kind: input, shape index: {}]   ;;  %s1429_s4 = inlined_call_operand.vmem [shape: f32[32,32], index: 4, kind: input, shape index: {}]   ;;  %s1430_s6 = inlined_call_operand.vmem [shape: f32[1,32], index: 6, kind: input, shape index: {}]   ;;  %s1431_s5 = inlined_call_operand.vmem [shape: f32[32,32], index: 5, kind: input, shape index: {}]   ;;  %s1432_s7 = inlined_call_operand.vmem [shape: f32[8,32,1], index: 7, kind: input, shape index: {}]   ;;  %s1433_s8 = inlined_call_operand.<no memory space> [shape: f32[1,1], index: 8, kind: input, shape index: {}]   ;;  %s1434_s9 = inlined_call_operand.vmem [shape: f32[2,1], index: 9, kind: output, shape index: {}]  }
   0x1   :  { %v34_v0 = vld [vmem:[%s1425_s1] sm:$0xf]  ;;  %v51_v3 = vld [vmem:[%s1426_s0 + $0x4] sm:$0x3]  ;;  %v52_v4 = vld [vmem:[%s1426_s0 + $0x6] sm:$0x3] }
   0x2   :  { %v49_v1 = vld [vmem:[%s1426_s0] sm:$0x3]  ;;  %v50_v2 = vld [vmem:[%s1426_s0 + $0x2] sm:$0x3]  ;;  %947 = vmatpush.msk.msra.mxu0 %vm87_vm0, %v34_v0  ;;  %69 = vst [vmem:[#allocation1 + $0x2] ss:$4 sm:$0xff] %v51_v3 }
   0x3   :  { %65 = vst [vmem:[#allocation1] ss:$4 sm:$0xff] %v49_v1  ;;  %v1084_v6 = vld [vmem:[%s1428_s2 + $0x18] sm:$0xff]  ;;  %v1094_v8 = vld [vmem:[%s1428_s2 + $0x10] sm:$0xff]  ;;  %v1106_v10 = vld [vmem:[%s1428_s2 + $0x8] sm:$0xff]  ;;  %vm922_vm4 = vcmask 1024  }
   0x4   :  { %67 = vst [vmem:[#allocation1 + $0x1] ss:$4 sm:$0xff] %v50_v2  ;;  %v1089_v7 = vld [vmem:[%s1429_s4 + $0x18] sm:$0xff]  ;;  %168 = vmatpush.msra.mxu1 %v1084_v6  ;;  %v1101_v9 = vld [vmem:[%s1429_s4 + $0x10] sm:$0xff]  ;;  %v1111_v11 = vld [vmem:[%s1429_s4 + $0x8] sm:$0xff]  ;;  %220 = vmatpush.msra.mxu3 %v1084_v6 }
   0x5   :  { %71 = vst [vmem:[#allocation1 + $0x3] ss:$4 sm:$0xff] %v52_v4  ;;  %193 = vmatpush.msra.mxu2 %v1089_v7  ;;  %316 = vmatpush.msrb.mxu0 %v1089_v7  ;;  %v1120_v12 = vld [vmem:[%s1428_s2] sm:$0xff]  ;;  %v1163_v25 = vld [vmem:[%s1431_s5 + $0x18] sm:$0xff]  ;;  %v1170_v26 = vld [vmem:[%s1431_s5 + $0x10] sm:$0xff] }
   0x6   :  { %169 = vmatpush.msra.mxu1 %v1094_v8  ;;  %v1125_v13 = vld [vmem:[%s1429_s4] sm:$0xff]  ;;  %221 = vmatpush.msra.mxu3 %v1094_v8  ;;  %v1178_v27 = vld [vmem:[%s1431_s5 + $0x8] sm:$0xff] }
   0x7   :  { %194 = vmatpush.msra.mxu2 %v1101_v9  ;;  %317 = vmatpush.msrb.mxu0 %v1101_v9  ;;  %v1148_v14 = vld [vmem:[%s1427_s3] ss:$0 sm:$0xff]  ;;  %v53_v37 = vld [vmem:[%s1426_s0 + $0x8] sm:$0x3]  ;;  %v54_v38 = vld [vmem:[%s1426_s0 + $0xa] sm:$0x3] }
   0x8   :  { %170 = vmatpush.msra.mxu1 %v1106_v10  ;;  %222 = vmatpush.msra.mxu3 %v1106_v10  ;;  %v1186_v28 = vld [vmem:[%s1431_s5] sm:$0xff]  ;;  %v55_v39 = vld [vmem:[%s1426_s0 + $0xc] sm:$0x3]  ;;  %v56_v40 = vld [vmem:[%s1426_s0 + $0xe] sm:$0x3] }
   0x9   :  { %195 = vmatpush.msra.mxu2 %v1111_v11  ;;  %318 = vmatpush.msrb.mxu0 %v1111_v11  ;;  %v1199_v32 = vld [vmem:[%s1430_s6] ss:$0 sm:$0xff]  ;;  %73 = vst [vmem:[#allocation1 + $0x20] ss:$4 sm:$0xff] %v53_v37  ;;  %v724_v37 = vld [vmem:[%s1432_s7 + $0x90] sm:$0xff] }
   0xa   :  { %171 = vmatpush.msra.mxu1 %v1120_v12  ;;  %223 = vmatpush.msra.mxu3 %v1120_v12  ;;  %75 = vst [vmem:[#allocation1 + $0x21] ss:$4 sm:$0xff] %v54_v38  ;;  %v723_v38 = vld [vmem:[%s1432_s7 + $0x88] sm:$0xff] }
   0xb   :  { %196 = vmatpush.msra.mxu2 %v1125_v13  ;;  %319 = vmatpush.msrb.mxu0 %v1125_v13  ;;  %77 = vst [vmem:[#allocation1 + $0x22] ss:$4 sm:$0xff] %v55_v39 }
   0xc   :  { %v80_v5 = vld.sshfl [vmem:[#allocation1] sm:$0xff pattern:$0x73625140]  ;;  %242 = vmatpush.msrb.mxu1 %v1089_v7  ;;  %294 = vmatpush.msrb.mxu3 %v1084_v6  ;;  %79 = vst [vmem:[#allocation1 + $0x23] ss:$4 sm:$0xff] %v56_v40 }
   0xd   :  { %948 = vmatmul.msk.f32.vlgmr.msra.gmra.mxu0 %vm82_vm1, %v80_v5  ;;  %265 = vmatpush.msrb.mxu2 %v1163_v25 }
   0xe   :  { %243 = vmatpush.msrb.mxu1 %v1101_v9  ;;  %295 = vmatpush.msrb.mxu3 %v1094_v8 }
   0xf   :  { %413 = vmatpush.msra.mxu0 %v1163_v25  ;;  %266 = vmatpush.msrb.mxu2 %v1170_v26 }
  0x10   :  { %244 = vmatpush.msrb.mxu1 %v1111_v11  ;;  %296 = vmatpush.msrb.mxu3 %v1106_v10 }
  0x11   :  { %414 = vmatpush.msra.mxu0 %v1170_v26  ;;  %267 = vmatpush.msrb.mxu2 %v1178_v27 }
  0x12   :  { %245 = vmatpush.msrb.mxu1 %v1125_v13  ;;  %297 = vmatpush.msrb.mxu3 %v1120_v12 }
  0x13   :  { %415 = vmatpush.msra.mxu0 %v1178_v27  ;;  %268 = vmatpush.msrb.mxu2 %v1186_v28  ;;  %v81_v41 = vld.sshfl [vmem:[#allocation1 + $0x20] sm:$0xff pattern:$0x73625140] }
  0x15   :  { %416 = vmatpush.msra.mxu0 %v1186_v28 }
  0x16   :  { %949 = vmatmul.msk.f32.gmra.mxu0 %vm82_vm1, %v81_v41  ;;  %v722_v41 = vld [vmem:[%s1432_s7 + $0x80] sm:$0xff] }
  0x8a   :  { %v108_v15 = vpop.f32.mrf.mxu0 }
  0x8b   :  { %v116_v16 = vrot.slane %v108_v15, 2  ;;  %v117_v17 = vrot.slane %v108_v15, 4  ;;  %v118_v18 = vrot.slane %v108_v15, 6  ;;  %v131_v19 = vadd.f32 %v1148_v14, %v108_v15 }
  0x8d   :  { %v132_v20 = vadd.f32 %v1148_v14, %v116_v16  ;;  %v133_v21 = vadd.f32 %v1148_v14, %v117_v17  ;;  %v134_v22 = vadd.f32 %v1148_v14, %v118_v18  ;;  %140 = vst.msk [vmem:[#allocation2] sm:$0x3] %vm139_vm2, %v131_v19 }
  0x8f   :  { %141 = vst.msk [vmem:[#allocation2 + $0x2] sm:$0x3] %vm139_vm2, %v132_v20 }
  0x90   :  { %142 = vst.msk [vmem:[#allocation2 + $0x4] sm:$0x3] %vm139_vm2, %v133_v21 }
  0x91   :  { %143 = vst.msk [vmem:[#allocation2 + $0x6] sm:$0x3] %vm139_vm2, %v134_v22  ;;  %v709_v22 = vld [vmem:[%s1432_s7 + $0x18] sm:$0xff] }
  0x93   :  { %v111_v51 = vpop.f32.mrf.mxu0 }
  0x94   :  { %v148_v23 = vld [vmem:[#allocation2] sm:$0x3]  ;;  %v119_v52 = vrot.slane %v111_v51, 2  ;;  %v120_v53 = vrot.slane %v111_v51, 4  ;;  %v121_v54 = vrot.slane %v111_v51, 6  ;;  %v135_v55 = vadd.f32 %v1148_v14, %v111_v51 }
  0x95   :  { %983 = vtanh.f32 %v148_v23  ;;  %v708_v23 = vld [vmem:[%s1432_s7 + $0x10] sm:$0xff] }
  0x96   :  { %v151_v29 = vld [vmem:[#allocation2 + $0x2] sm:$0x3]  ;;  %v136_v56 = vadd.f32 %v1148_v14, %v119_v52  ;;  %v137_v57 = vadd.f32 %v1148_v14, %v120_v53  ;;  %v138_v58 = vadd.f32 %v1148_v14, %v121_v54  ;;  %144 = vst.msk [vmem:[#allocation2 + $0x8] sm:$0x3] %vm139_vm2, %v135_v55  ;;  %v717_v52 = vld [vmem:[%s1432_s7 + $0x58] sm:$0xff]  ;;  %v716_v53 = vld [vmem:[%s1432_s7 + $0x50] sm:$0xff] }
  0x97   :  { %v204_v42 = vld [vmem:[#allocation2 + $0x4] sm:$0x3]  ;;  %v714_v55 = vld [vmem:[%s1432_s7 + $0x40] sm:$0xff] }
  0x98   :  { %145 = vst.msk [vmem:[#allocation2 + $0xa] sm:$0x3] %vm139_vm2, %v136_v56  ;;  %v278_v61 = vld [vmem:[#allocation2 + $0x6] sm:$0x3]  ;;  %v721_v56 = vld [vmem:[%s1432_s7 + $0x78] sm:$0xff] }
  0x99   :  { %146 = vst.msk [vmem:[#allocation2 + $0xc] sm:$0x3] %vm139_vm2, %v137_v57  ;;  %v715_v54 = vld [vmem:[%s1432_s7 + $0x48] sm:$0xff]  ;;  %v720_v57 = vld [vmem:[%s1432_s7 + $0x70] sm:$0xff] }
  0x9a   :  { %147 = vst.msk [vmem:[#allocation2 + $0xe] sm:$0x3] %vm139_vm2, %v138_v58  ;;  %v719_v58 = vld [vmem:[%s1432_s7 + $0x68] sm:$0xff] }
  0x9b   :  { %v984_v24 = vpop.eup %983 }
  0x9c   :  { %950 = vmatmul.msk.f32.vlgmr.msra.gmra.mxu1 %vm152_vm3, %v984_v24  ;;  %951 = vmatmul.msk.f32.vlgmr.msra.gmra.mxu2 %vm152_vm3, %v984_v24  ;;  %v707_v24 = vld [vmem:[%s1432_s7 + $0x8] sm:$0xff] }
  0x9d   :  { %339 = vmatpush.msra.mxu1 %v1163_v25  ;;  %368 = vmatpush.msra.mxu2 %v1084_v6  ;;  %v352_v4 = vld [vmem:[#allocation2 + $0x8] sm:$0x3] }
  0x9f   :  { %340 = vmatpush.msra.mxu1 %v1170_v26  ;;  %369 = vmatpush.msra.mxu2 %v1094_v8 }
  0xa1   :  { %341 = vmatpush.msra.mxu1 %v1178_v27  ;;  %370 = vmatpush.msra.mxu2 %v1106_v10 }
  0xa3   :  { %342 = vmatpush.msra.mxu1 %v1186_v28  ;;  %371 = vmatpush.msra.mxu2 %v1120_v12 }
 0x119   :  { %v173_v30 = vpop.f32.mrf.mxu1 }
 0x11a   :  { %v176_v31 = vadd.f32 %v173_v30, %v151_v29  ;;  %v710_v29 = vld [vmem:[%s1432_s7 + $0x20] sm:$0xff]  ;;  %v500_v30 = vld [vmem:[#allocation2 + $0xc] sm:$0x3] }
 0x11c   :  { %985 = vtanh.f32 %v176_v31 }
 0x11f   :  { %v198_v33 = vpop.f32.mrf.mxu2 }
 0x120   :  { %v199_v34 = vadd.f32 %v1199_v32, %v198_v33 }
 0x122   :  { %v986_v35 = vpop.eup %985  ;;  %987 = vtanh.f32 %v199_v34  ;;  %v725_v34 = vld [vmem:[%s1432_s7 + $0x98] sm:$0xff] }
 0x123   :  { %952 = vmatmul.msk.f32.vlgmr.msra.gmra.mxu3 %vm152_vm3, %v986_v35  ;;  %953 = vmatmul.msk.f32.vlgmr.msrb.gmra.mxu1 %vm152_vm3, %v986_v35 }
 0x124   :  { %390 = vmatpush.msra.mxu3 %v1089_v7  ;;  %442 = vmatpush.msrb.mxu1 %v1084_v6 }
 0x126   :  { %391 = vmatpush.msra.mxu3 %v1101_v9  ;;  %443 = vmatpush.msrb.mxu1 %v1094_v8 }
 0x128   :  { %v988_v36 = vpop.eup %987  ;;  %392 = vmatpush.msra.mxu3 %v1111_v11  ;;  %444 = vmatpush.msrb.mxu1 %v1106_v10 }
 0x129   :  { %202 = vst.msk [vmem:[#allocation3] sm:$0x3] %vm139_vm2, %v988_v36  ;;  %954 = vmatmul.msk.f32.vlgmr.msrb.gmra.mxu2 %vm152_vm3, %v988_v36 }
 0x12a   :  { %393 = vmatpush.msra.mxu3 %v1125_v13  ;;  %464 = vmatpush.msrb.mxu2 %v1089_v7 }
 0x12b   :  { %445 = vmatpush.msrb.mxu1 %v1120_v12 }
 0x12c   :  { %465 = vmatpush.msrb.mxu2 %v1101_v9 }
 0x12e   :  { %466 = vmatpush.msrb.mxu2 %v1111_v11 }
 0x130   :  { %467 = vmatpush.msrb.mxu2 %v1125_v13 }
 0x1a0   :  { %v247_v45 = vpop.f32.mrf.mxu1 }
 0x1a1   :  { %v248_v46 = vadd.f32 %v1199_v32, %v247_v45 }
 0x1a6   :  { %v225_v43 = vpop.f32.mrf.mxu3 }
 0x1a7   :  { %v228_v44 = vadd.f32 %v225_v43, %v204_v42  ;;  %v698_v43 = vld [vmem:[#allocation3] sm:$0x3] }
 0x1a9   :  { %989 = vtanh.f32 %v228_v44  ;;  %v729_v44 = vld [vmem:[%s1432_s7 + $0xb8] sm:$0xff] }
 0x1ac   :  { %v270_v47 = vpop.f32.mrf.mxu2 }
 0x1ad   :  { %v273_v48 = vadd.f32 %v270_v47, %v248_v46  ;;  %v728_v46 = vld [vmem:[%s1432_s7 + $0xb0] sm:$0xff] }
 0x1af   :  { %v990_v49 = vpop.eup %989  ;;  %991 = vtanh.f32 %v273_v48  ;;  %v727_v48 = vld [vmem:[%s1432_s7 + $0xa8] sm:$0xff] }
 0x1b0   :  { %955 = vmatmul.msk.f32.vlgmr.msrb.gmra.mxu3 %vm152_vm3, %v990_v49  ;;  %956 = vmatmul.msk.f32.vlgmr.msrb.gmra.mxu0 %vm152_vm3, %v990_v49  ;;  %v726_v49 = vld [vmem:[%s1432_s7 + $0xa0] sm:$0xff] }
 0x1b1   :  { %487 = vmatpush.msrb.mxu3 %v1163_v25  ;;  %516 = vmatpush.msrb.mxu0 %v1084_v6 }
 0x1b3   :  { %488 = vmatpush.msrb.mxu3 %v1170_v26  ;;  %517 = vmatpush.msrb.mxu0 %v1094_v8 }
 0x1b5   :  { %v992_v50 = vpop.eup %991  ;;  %489 = vmatpush.msrb.mxu3 %v1178_v27  ;;  %518 = vmatpush.msrb.mxu0 %v1106_v10 }
 0x1b6   :  { %276 = vst.msk [vmem:[#allocation3 + $0x2] sm:$0x3] %vm139_vm2, %v992_v50  ;;  %957 = vmatmul.msk.f32.vlgmr.msra.gmra.mxu1 %vm152_vm3, %v992_v50 }
 0x1b7   :  { %490 = vmatpush.msrb.mxu3 %v1186_v28  ;;  %538 = vmatpush.msra.mxu1 %v1089_v7 }
 0x1b8   :  { %519 = vmatpush.msrb.mxu0 %v1120_v12 }
 0x1b9   :  { %539 = vmatpush.msra.mxu1 %v1101_v9 }
 0x1bb   :  { %540 = vmatpush.msra.mxu1 %v1111_v11 }
 0x1bd   :  { %541 = vmatpush.msra.mxu1 %v1125_v13  ;;  %v699_v50 = vld [vmem:[#allocation3 + $0x2] sm:$0x3] }
 0x22d   :  { %v321_v59 = vpop.f32.mrf.mxu0 }
 0x22e   :  { %v322_v60 = vadd.f32 %v1199_v32, %v321_v59  ;;  %v718_v59 = vld [vmem:[%s1432_s7 + $0x60] sm:$0xff] }
 0x233   :  { %v299_v62 = vpop.f32.mrf.mxu3  ;;  %v344_v63 = vpop.f32.mrf.mxu1 }
 0x234   :  { %v302_v0 = vadd.f32 %v299_v62, %v278_v61  ;;  %v347_v1 = vadd.f32 %v344_v63, %v322_v60  ;;  %v574_v60 = vld [vmem:[#allocation2 + $0xe] sm:$0x3] }
 0x236   :  { %993 = vtanh.f32 %v302_v0 }
 0x237   :  { %995 = vtanh.f32 %v347_v1 }
 0x23c   :  { %v994_v2 = vpop.eup %993 }
 0x23d   :  { %v996_v3 = vpop.eup %995  ;;  %958 = vmatmul.msk.f32.vlgmr.msra.gmra.mxu2 %vm152_vm3, %v994_v2  ;;  %959 = vmatmul.msk.f32.vlgmr.msra.gmra.mxu3 %vm152_vm3, %v994_v2  ;;  %v733_v2 = vld [vmem:[%s1432_s7 + $0xd8] sm:$0xff] }
 0x23e   :  { %350 = vst.msk [vmem:[#allocation3 + $0x4] sm:$0x3] %vm139_vm2, %v996_v3  ;;  %960 = vmatmul.msk.f32.vlgmr.msra.gmra.mxu0 %vm152_vm3, %v996_v3  ;;  %561 = vmatpush.msra.mxu2 %v1163_v25 }
 0x23f   :  { %590 = vmatpush.msra.mxu3 %v1084_v6  ;;  %612 = vmatpush.msra.mxu0 %v1089_v7 }
 0x240   :  { %562 = vmatpush.msra.mxu2 %v1170_v26 }
 0x241   :  { %591 = vmatpush.msra.mxu3 %v1094_v8  ;;  %613 = vmatpush.msra.mxu0 %v1101_v9 }
 0x242   :  { %563 = vmatpush.msra.mxu2 %v1178_v27 }
 0x243   :  { %592 = vmatpush.msra.mxu3 %v1106_v10  ;;  %614 = vmatpush.msra.mxu0 %v1111_v11 }
 0x244   :  { %564 = vmatpush.msra.mxu2 %v1186_v28 }
 0x245   :  { %593 = vmatpush.msra.mxu3 %v1120_v12  ;;  %615 = vmatpush.msra.mxu0 %v1125_v13 }
 0x2bb   :  { %v418_v15 = vpop.f32.mrf.mxu0 }
 0x2c0   :  { %v373_v5 = vpop.f32.mrf.mxu2  ;;  %v395_v6 = vpop.f32.mrf.mxu3 }
 0x2c1   :  { %v376_v14 = vadd.f32 %v373_v5, %v352_v4  ;;  %v396_v8 = vadd.f32 %v1199_v32, %v395_v6  ;;  %v732_v5 = vld [vmem:[%s1432_s7 + $0xd0] sm:$0xff]  ;;  %v731_v6 = vld [vmem:[%s1432_s7 + $0xc8] sm:$0xff] }
 0x2c3   :  { %997 = vtanh.f32 %v376_v14  ;;  %v421_v16 = vadd.f32 %v418_v15, %v396_v8  ;;  %v730_v14 = vld [vmem:[%s1432_s7 + $0xc0] sm:$0xff]  ;;  %v700_v15 = vld [vmem:[#allocation3 + $0x4] sm:$0x3] }
 0x2c5   :  { %999 = vtanh.f32 %v421_v16 }
 0x2c9   :  { %v998_v17 = vpop.eup %997 }
 0x2ca   :  { %961 = vmatmul.msk.f32.vlgmr.msrb.gmra.mxu1 %vm152_vm3, %v998_v17  ;;  %962 = vmatmul.msk.f32.vlgmr.msrb.gmra.mxu2 %vm152_vm3, %v998_v17 }
 0x2cb   :  { %v1000_v10 = vpop.eup %999  ;;  %635 = vmatpush.msrb.mxu1 %v1163_v25  ;;  %662 = vmatpush.msrb.mxu2 %v1089_v7  ;;  %v426_v7 = vld [vmem:[#allocation2 + $0xa] sm:$0x3] }
 0x2cc   :  { %424 = vst.msk [vmem:[#allocation3 + $0x6] sm:$0x3] %vm139_vm2, %v1000_v10  ;;  %963 = vmatmul.msk.f32.vlgmr.msrb.gmra.mxu3 %vm152_vm3, %v1000_v10  ;;  %v737_v10 = vld [vmem:[%s1432_s7 + $0xf8] sm:$0xff] }
 0x2cd   :  { %636 = vmatpush.msrb.mxu1 %v1170_v26  ;;  %663 = vmatpush.msrb.mxu2 %v1101_v9 }
 0x2ce   :  { %685 = vmatpush.msrb.mxu3 %v1163_v25  ;;  %v706_v25 = vld [vmem:[%s1432_s7] sm:$0xff] }
 0x2cf   :  { %637 = vmatpush.msrb.mxu1 %v1178_v27  ;;  %664 = vmatpush.msrb.mxu2 %v1111_v11 }
 0x2d0   :  { %686 = vmatpush.msrb.mxu3 %v1170_v26  ;;  %v713_v26 = vld [vmem:[%s1432_s7 + $0x38] sm:$0xff] }
 0x2d1   :  { %638 = vmatpush.msrb.mxu1 %v1186_v28  ;;  %665 = vmatpush.msrb.mxu2 %v1125_v13 }
 0x2d2   :  { %687 = vmatpush.msrb.mxu3 %v1178_v27  ;;  %v712_v27 = vld [vmem:[%s1432_s7 + $0x30] sm:$0xff] }
 0x2d3   :  { %v701_v16 = vld [vmem:[#allocation3 + $0x6] sm:$0x3] }
 0x2d4   :  { %688 = vmatpush.msrb.mxu3 %v1186_v28  ;;  %v711_v28 = vld [vmem:[%s1432_s7 + $0x28] sm:$0xff] }
 0x347   :  { %v447_v12 = vpop.f32.mrf.mxu1 }
 0x348   :  { %v450_v18 = vadd.f32 %v447_v12, %v426_v7  ;;  %v736_v7 = vld [vmem:[%s1432_s7 + $0xf0] sm:$0xff]  ;;  %v735_v12 = vld [vmem:[%s1432_s7 + $0xe8] sm:$0xff] }
 0x34a   :  { %1001 = vtanh.f32 %v450_v18  ;;  %v734_v18 = vld [vmem:[%s1432_s7 + $0xe0] sm:$0xff] }
 0x34d   :  { %v469_v9 = vpop.f32.mrf.mxu2 }
 0x34e   :  { %v470_v19 = vadd.f32 %v1199_v32, %v469_v9  ;;  %v14_v9 = vstv %s1433_s8 }
 0x34f   :  { %v492_v20 = vpop.f32.mrf.mxu3  ;;  %15 = vst [vmem:[#allocation4] sm:$0x1] %v14_v9 }
 0x350   :  { %v1002_v21 = vpop.eup %1001  ;;  %v495_v11 = vadd.f32 %v492_v20, %v470_v19 }
 0x351   :  { %964 = vmatmul.msk.f32.vlgmr.msrb.gmra.mxu0 %vm152_vm3, %v1002_v21  ;;  %965 = vmatmul.msk.f32.vlgmr.msra.gmra.mxu1 %vm152_vm3, %v1002_v21 }
 0x352   :  { %1003 = vtanh.f32 %v495_v11  ;;  %753 = vmatpush.msrb.mxu0 %v709_v22  ;;  %776 = vmatpush.msra.mxu1 %v713_v26 }
 0x354   :  { %754 = vmatpush.msrb.mxu0 %v708_v23  ;;  %777 = vmatpush.msra.mxu1 %v712_v27 }
 0x356   :  { %755 = vmatpush.msrb.mxu0 %v707_v24  ;;  %778 = vmatpush.msra.mxu1 %v711_v28 }
 0x358   :  { %v1004_v13 = vpop.eup %1003  ;;  %756 = vmatpush.msrb.mxu0 %v706_v25  ;;  %779 = vmatpush.msra.mxu1 %v710_v29 }
 0x359   :  { %498 = vst.msk [vmem:[#allocation3 + $0x8] sm:$0x3] %vm139_vm2, %v1004_v13  ;;  %966 = vmatmul.msk.f32.vlgmr.msra.gmra.mxu2 %vm152_vm3, %v1004_v13 }
 0x35a   :  { %799 = vmatpush.msra.mxu2 %v717_v52 }
 0x35c   :  { %800 = vmatpush.msra.mxu2 %v716_v53 }
 0x35e   :  { %801 = vmatpush.msra.mxu2 %v715_v54 }
 0x360   :  { %v702_v47 = vld [vmem:[#allocation3 + $0x8] sm:$0x3]  ;;  %802 = vmatpush.msra.mxu2 %v714_v55 }
 0x3ce   :  { %v521_v31 = vpop.f32.mrf.mxu0  ;;  %v543_v36 = vpop.f32.mrf.mxu1 }
 0x3cf   :  { %v524_v33 = vadd.f32 %v521_v31, %v500_v30  ;;  %v544_v39 = vadd.f32 %v1199_v32, %v543_v36 }
 0x3d1   :  { %1005 = vtanh.f32 %v524_v33 }
 0x3d7   :  { %v1006_v35 = vpop.eup %1005 }
 0x3d8   :  { %967 = vmatmul.msk.f32.vlgmr.msra.gmra.mxu3 %vm152_vm3, %v1006_v35  ;;  %968 = vmatmul.msk.f32.vlgmr.msra.gmra.mxu0 %vm152_vm3, %v1006_v35 }
 0x3d9   :  { %845 = vmatpush.msra.mxu0 %v725_v34  ;;  %822 = vmatpush.msra.mxu3 %v721_v56 }
 0x3db   :  { %846 = vmatpush.msra.mxu0 %v724_v37  ;;  %823 = vmatpush.msra.mxu3 %v720_v57 }
 0x3dc   :  { %v566_v40 = vpop.f32.mrf.mxu2 }
 0x3dd   :  { %v569_v42 = vadd.f32 %v566_v40, %v544_v39  ;;  %847 = vmatpush.msra.mxu0 %v723_v38  ;;  %824 = vmatpush.msra.mxu3 %v719_v58 }
 0x3df   :  { %1007 = vtanh.f32 %v569_v42  ;;  %848 = vmatpush.msra.mxu0 %v722_v41  ;;  %825 = vmatpush.msra.mxu3 %v718_v59 }
 0x3e0   :  { %972 = vmatmul.msk.f32.vlgmr.msrb.gmra.mxu0 %vm152_vm3, %v698_v43 }
 0x3e5   :  { %v1008_v45 = vpop.eup %1007 }
 0x3e6   :  { %572 = vst.msk [vmem:[#allocation3 + $0xa] sm:$0x3] %vm139_vm2, %v1008_v45  ;;  %969 = vmatmul.msk.f32.vlgmr.msrb.gmra.mxu1 %vm152_vm3, %v1008_v45 }
 0x3e7   :  { %868 = vmatpush.msrb.mxu1 %v729_v44  ;;  %v982_v44 = vld [vmem:[#allocation4] ss:$0 sm:$0xff] }
 0x3e8   :  { %976 = vmatmul.msk.f32.vlgmr.msra.gmra.mxu0 %vm152_vm3, %v702_v47 }
 0x3e9   :  { %869 = vmatpush.msrb.mxu1 %v728_v46 }
 0x3eb   :  { %870 = vmatpush.msrb.mxu1 %v727_v48 }
 0x3ed   :  { %871 = vmatpush.msrb.mxu1 %v726_v49  ;;  %v703_v51 = vld [vmem:[#allocation3 + $0xa] sm:$0x3] }
 0x3ee   :  { %973 = vmatmul.msk.f32.vlgmr.msra.gmra.mxu1 %vm152_vm3, %v699_v50 }
 0x3f6   :  { %977 = vmatmul.msk.f32.vlgmr.msrb.gmra.mxu1 %vm152_vm3, %v703_v51 }
 0x455   :  { %v617_v63 = vpop.f32.mrf.mxu0 }
 0x456   :  { %v618_v0 = vadd.f32 %v1199_v32, %v617_v63 }
 0x45b   :  { %v595_v61 = vpop.f32.mrf.mxu3 }
 0x45c   :  { %v598_v62 = vadd.f32 %v595_v61, %v574_v60 }
 0x45d   :  { %v758_v23 = vpop.f32.mrf.mxu0 }
 0x45e   :  { %1009 = vtanh.f32 %v598_v62  ;;  %v923_v28 = vsel %vm922_vm4, %v758_v23, 0.0 }
 0x463   :  { %v640_v1 = vpop.f32.mrf.mxu1 }
 0x464   :  { %v1010_v3 = vpop.eup %1009  ;;  %v643_v4 = vadd.f32 %v640_v1, %v618_v0 }
 0x465   :  { %970 = vmatmul.msk.f32.vlgmr.msrb.gmra.mxu2 %vm152_vm3, %v1010_v3  ;;  %v850_v33 = vpop.f32.mrf.mxu0 }
 0x466   :  { %1011 = vtanh.f32 %v643_v4  ;;  %891 = vmatpush.msrb.mxu2 %v733_v2  ;;  %v930_v35 = vsel %vm922_vm4, %v850_v33, 0.0 }
 0x468   :  { %892 = vmatpush.msrb.mxu2 %v732_v5 }
 0x46a   :  { %893 = vmatpush.msrb.mxu2 %v731_v6 }
 0x46b   :  { %v781_v24 = vpop.f32.mrf.mxu1 }
 0x46c   :  { %v1012_v8 = vpop.eup %1011  ;;  %894 = vmatpush.msrb.mxu2 %v730_v14  ;;  %v924_v26 = vsel %vm922_vm4, %v781_v24, 0.0 }
 0x46d   :  { %646 = vst.msk [vmem:[#allocation3 + $0xc] sm:$0x3] %vm139_vm2, %v1012_v8  ;;  %971 = vmatmul.msk.f32.vlgmr.msrb.gmra.mxu3 %vm152_vm3, %v1012_v8  ;;  %974 = vmatmul.msk.f32.vlgmr.msra.gmra.mxu2 %vm152_vm3, %v700_v15  ;;  %v925_v29 = vadd.f32 %v924_v26, %v923_v28 }
 0x46e   :  { %914 = vmatpush.msrb.mxu3 %v737_v10 }
 0x470   :  { %915 = vmatpush.msrb.mxu3 %v736_v7 }
 0x472   :  { %916 = vmatpush.msrb.mxu3 %v735_v12 }
 0x473   :  { %v873_v36 = vpop.f32.mrf.mxu1 }
 0x474   :  { %v704_v17 = vld [vmem:[#allocation3 + $0xc] sm:$0x3]  ;;  %917 = vmatpush.msrb.mxu3 %v734_v18  ;;  %v932_v38 = vsel %vm922_vm4, %v873_v36, 0.0 }
 0x475   :  { %975 = vmatmul.msk.f32.vlgmr.msra.gmra.mxu3 %vm152_vm3, %v701_v16  ;;  %978 = vmatmul.msk.f32.vlgmr.msrb.gmra.mxu2 %vm152_vm3, %v704_v17 }
 0x4e8   :  { %v667_v19 = vpop.f32.mrf.mxu2 }
 0x4e9   :  { %v668_v20 = vadd.f32 %v1199_v32, %v667_v19 }
 0x4f0   :  { %v690_v21 = vpop.f32.mrf.mxu3  ;;  %v804_v25 = vpop.f32.mrf.mxu2 }
 0x4f1   :  { %v693_v11 = vadd.f32 %v690_v21, %v668_v20  ;;  %v926_v32 = vsel %vm922_vm4, %v804_v25, 0.0 }
 0x4f2   :  { %v927_v31 = vadd.f32 %v926_v32, %v925_v29 }
 0x4f3   :  { %1013 = vtanh.f32 %v693_v11 }
 0x4f8   :  { %v827_v27 = vpop.f32.mrf.mxu3  ;;  %v896_v39 = vpop.f32.mrf.mxu2 }
 0x4f9   :  { %v1014_v13 = vpop.eup %1013  ;;  %v928_v30 = vsel %vm922_vm4, %v827_v27, 0.0  ;;  %v934_v41 = vsel %vm922_vm4, %v896_v39, 0.0 }
 0x4fa   :  { %696 = vst.msk [vmem:[#allocation3 + $0xe] sm:$0x3] %vm139_vm2, %v1014_v13  ;;  %v929_v34 = vadd.f32 %v928_v30, %v927_v31 }
 0x4fc   :  { %v931_v37 = vadd.f32 %v930_v35, %v929_v34 }
 0x4fe   :  { %v933_v40 = vadd.f32 %v932_v38, %v931_v37 }
 0x500   :  { %v935_v42 = vadd.f32 %v934_v41, %v933_v40 }
 0x501   :  { %v705_v22 = vld [vmem:[#allocation3 + $0xe] sm:$0x3] }
 0x502   :  { %979 = vmatmul.msk.f32.vlgmr.msrb.gmra.mxu3 %vm152_vm3, %v705_v22 }
 0x585   :  { %v919_v43 = vpop.f32.mrf.mxu3 }
 0x586   :  { %v936_v45 = vsel %vm922_vm4, %v919_v43, 0.0 }
 0x587   :  { %v937_v46 = vadd.f32 %v936_v45, %v935_v42 }
 0x589   :  { %v941_v47 = vadd.f32 %v982_v44, %v937_v46 }
 0x58b   :  { %942 = vst.msk [vmem:[%s1434_s9] sm:$0x3] %vm922_vm4, %v941_v47 }

</bundles_post_ra>
